<compile_context>
chip_gen: v5e
topology: v5e:2x2
jax: 0.10.0
libtpu: 0.0.40
codegen_flags: <defaults>
</compile_context>

<pallas_src>
import functools

import jax
import jax.numpy as jnp
from jax.experimental import pallas as pl
from jax.experimental.pallas import tpu as pltpu


# --------------------------------------------------------------------------
# Kernel
# --------------------------------------------------------------------------
def _head_kernel(x_ref, w1_ref, lng_ref, w2_ref, b2_ref, o_ref, acc_ref):
    """Grid = (B // TB, H // TK).  Axis 1 (K) is the W1 contraction axis."""
    k = pl.program_id(1)

    @pl.when(k == 0)
    def _init():
        acc_ref[...] = jnp.zeros_like(acc_ref)

    # Streamed partial matmul: [TB, TK] @ [TK, H] -> f32 accumulation.
    acc_ref[...] += jnp.dot(x_ref[...], w1_ref[...],
                            preferred_element_type=jnp.float32)

    @pl.when(k == pl.num_programs(1) - 1)
    def _finalize():
        lng = lng_ref[...].astype(jnp.float32)          # (3, H): b1, gamma, beta

        # h = acc + b1   (in place)
        acc_ref[...] += lng[0:1, :]
        h = acc_ref[...]

        # LayerNorm over hidden dim (biased variance, eps=1e-5).
        mean = jnp.mean(h, axis=-1, keepdims=True)
        acc_ref[...] = h - mean                          # centered, in place
        centered = acc_ref[...]
        var = jnp.mean(centered * centered, axis=-1, keepdims=True)
        acc_ref[...] = (centered * jax.lax.rsqrt(var + 1e-5)
                        * lng[1:2, :] + lng[2:3, :])     # normalized+affine
        hn = acc_ref[...]

        # Exact GELU: 0.5 * x * (1 + erf(x / sqrt(2)))  (matches nn.GELU()).
        # Cast to the w2 dtype as early as possible to shrink live temps.
        g = (0.5 * hn * (1.0 + jax.lax.erf(hn * 0.7071067811865476))
             ).astype(w2_ref.dtype)

        # out_proj: [TB, H] @ [H, L] + b2  (small; once per batch tile).
        out = jnp.dot(g, w2_ref[...], preferred_element_type=jnp.float32)
        out = out + b2_ref[...].astype(jnp.float32)
        o_ref[...] = out.astype(o_ref.dtype)


# --------------------------------------------------------------------------
# Tiling / hardware helpers
# --------------------------------------------------------------------------
def _pick_tile(dim, target, multiple):
    """Largest tile <= target that divides `dim` and is a multiple of
    `multiple`; falls back to the full dim (always legal for BlockSpec)."""
    if dim <= target:
        return dim
    start = (target // multiple) * multiple
    for cand in range(start, 0, -multiple):
        if dim % cand == 0:
            return cand
    return dim


def _vmem_budget_bytes():
    """Explicit VMEM budget (scoped limit) derived from physical capacity."""
    try:
        cap = int(pltpu.get_tpu_info().vmem_capacity_bytes)
    except Exception:
        cap = 64 << 20            # conservative fallback (v7x per-TC)
    # Keep 1/8 headroom for compiler-internal scratch; cap at 112 MiB.
    return min(cap - (cap >> 3), 112 << 20)


def _batch_shards():
    """On v7x the batch axis should split 2-way so the 'parallel' grid axis
    shards across the chip's two TensorCores; elsewhere prefer a single batch
    tile so W1 is streamed from HBM exactly once."""
    try:
        kind = jax.devices()[0].device_kind.lower()
    except Exception:
        return 1
    return 2 if "v7" in kind else 1


def _plan_tiles(B, H, weight_itemsize, vmem_budget, batch_shards):
    """Pick (tb, tk) so that double-buffered W1 slabs + x tiles + f32 acc +
    finalize temporaries stay inside the VMEM budget, while minimizing the
    number of batch tiles (each one re-streams W1 from HBM)."""
    sub = 16 if weight_itemsize <= 2 else 8        # bf16 packs 2 rows/sublane
    usable = int(vmem_budget * 0.6)                # headroom for temps/padding

    # Batch tile: f32 accumulator + ~one finalize temp dominate (~8 B/elem).
    tb_cap = max(sub, (usable // 2) // (8 * H))
    if B % batch_shards == 0:
        tb_target = max(sub, B // batch_shards)
    else:
        tb_target = B
    tb = _pick_tile(B, min(tb_target, tb_cap), sub)

    # K tile: W1 double buffer (2*tk*H*ws) + x double buffer (2*tb*tk*ws).
    remaining = max(usable - 8 * tb * H, 2 * 128 * H * weight_itemsize)
    denom = 2 * weight_itemsize * (H + tb)
    tk_cap = max(128, remaining // max(denom, 1))
    tk = _pick_tile(H, min(tk_cap, 1024), 128)
    return tb, tk


# --------------------------------------------------------------------------
# Public API
# --------------------------------------------------------------------------
def prepare_params(params, compute_dtype=jnp.bfloat16):
    """One-time (outside the hot path) conversion of params into the layout
    the kernel streams: w1/w2 in the compute dtype, b1/gamma/beta packed into
    a single (3, H) f32 block, b2 as (1, L) f32.  Cache the result and reuse
    it across calls so the f32->bf16 weight cast is never paid per call."""
    w1 = params["w1"].astype(compute_dtype)                       # [H, H]
    w2 = params["w2"].astype(compute_dtype)                       # [H, L]
    H = w1.shape[0]
    L = w2.shape[1]
    lng = jnp.stack([params["b1"].astype(jnp.float32),
                     params["gamma"].astype(jnp.float32),
                     params["beta"].astype(jnp.float32)], axis=0)  # [3, H]
    b2 = params["b2"].reshape(1, L).astype(jnp.float32)            # [1, L]
    return {"w1": w1, "w2": w2, "lng": lng, "b2": b2}


def unimodal_classification_head(features, prepared):
    """features: [B, S, H]. `prepared` comes from prepare_params().
    Returns logits [B, num_labels] in features.dtype."""
    w1, w2, lng, b2 = (prepared["w1"], prepared["w2"],
                       prepared["lng"], prepared["b2"])
    B, S, H = features.shape
    L = w2.shape[1]
    wdtype = w1.dtype

    # CLS token slice stays in the wrapper: a [B, H] gather is negligible next
    # to the H^2 W1 stream, and a size-1 second-to-last block dim over S would
    # only add layout pain.  Slice first, cast only the [B, H] rows (and only
    # if the dtype actually differs).
    x_cls = features[:, 0, :]
    if x_cls.dtype != wdtype:
        x_cls = x_cls.astype(wdtype)

    vmem_budget = _vmem_budget_bytes()
    tb, tk = _plan_tiles(B, H, jnp.dtype(wdtype).itemsize,
                         vmem_budget, _batch_shards())
    grid = (B // tb, H // tk)

    # TODO(synk): if profiling shows exposed DMA for very short K loops
    # (H // tk <= 4), add pipeline_mode=pl.Buffered(3) on the W1 BlockSpec
    # where VMEM headroom exists.
    kernel = pl.pallas_call(
        _head_kernel,
        out_shape=jax.ShapeDtypeStruct((B, L), features.dtype),
        grid=grid,
        in_specs=[
            pl.BlockSpec((tb, tk), lambda b, k: (b, k)),   # x_cls (streamed K)
            pl.BlockSpec((tk, H), lambda b, k: (k, 0)),    # w1   (streamed K)
            pl.BlockSpec((3, H), lambda b, k: (0, 0)),     # b1/gamma/beta
            pl.BlockSpec((H, L), lambda b, k: (0, 0)),     # w2   (resident)
            pl.BlockSpec((1, L), lambda b, k: (0, 0)),     # b2   (resident)
        ],
        out_specs=pl.BlockSpec((tb, L), lambda b, k: (b, 0)),
        scratch_shapes=[pltpu.VMEM((tb, H), jnp.float32)],
        compiler_params=pltpu.CompilerParams(
            dimension_semantics=("parallel", "arbitrary"),
            vmem_limit_bytes=int(vmem_budget)),
    )
    return kernel(x_cls, w1, lng, w2, b2)


# --------------------------------------------------------------------------
# Parameter init + pure-JAX reference
# --------------------------------------------------------------------------
def init_params(key, hidden_size, num_labels):
    k1, k2, k3, k4 = jax.random.split(key, 4)
    scale = 1.0 / jnp.sqrt(hidden_size)
    return {
        "w1": jax.random.uniform(k1, (hidden_size, hidden_size),
                                 jnp.float32, -scale, scale),
        "b1": jax.random.uniform(k2, (hidden_size,), jnp.float32, -scale, scale),
        "gamma": jnp.ones((hidden_size,), jnp.float32),
        "beta": jnp.zeros((hidden_size,), jnp.float32),
        "w2": jax.random.uniform(k3, (hidden_size, num_labels),
                                 jnp.float32, -scale, scale),
        "b2": jax.random.uniform(k4, (num_labels,), jnp.float32, -scale, scale),
    }


def _reference(features, params):
    """Pure-JAX f32 reference (mirrors the PyTorch module)."""
    x = features[:, 0, :]
    h = x @ params["w1"] + params["b1"]
    mean = jnp.mean(h, axis=-1, keepdims=True)
    var = jnp.mean((h - mean) ** 2, axis=-1, keepdims=True)
    hn = (h - mean) / jnp.sqrt(var + 1e-5)
    hn = hn * params["gamma"] + params["beta"]
    g = 0.5 * hn * (1.0 + jax.lax.erf(hn / jnp.sqrt(2.0)))
    return g @ params["w2"] + params["b2"]


# --------------------------------------------------------------------------
# Demo / self-test
# --------------------------------------------------------------------------
if __name__ == "__main__":
    B, S, H, L = 2, 8, 32, 4

    key = jax.random.PRNGKey(0)
    k_feat, k_params = jax.random.split(key)
    features = jax.random.normal(k_feat, (B, S, H), jnp.float32)
    params = init_params(k_params, H, L)

    ref = _reference(features, params)

    # f32 path: numerical parity with the PyTorch module.
    prepared_f32 = prepare_params(params, compute_dtype=jnp.float32)
    logits_f32 = unimodal_classification_head(features, prepared_f32)
    jax.block_until_ready(logits_f32)
    assert logits_f32.shape == (B, L), logits_f32.shape
    assert jnp.allclose(logits_f32, ref, atol=2e-3, rtol=2e-3), (
        float(jnp.max(jnp.abs(logits_f32 - ref))))

    # bf16 path: performance configuration (bf16 MXU operands, f32 accum/LN).
    # Weights are cast ONCE here; reuse `prepared_bf16` across calls.
    prepared_bf16 = prepare_params(params, compute_dtype=jnp.bfloat16)
    logits_bf16 = unimodal_classification_head(features, prepared_bf16)
    jax.block_until_ready(logits_bf16)
    assert logits_bf16.shape == (B, L), logits_bf16.shape
    assert jnp.allclose(logits_bf16, ref, atol=5e-2, rtol=5e-2), (
        float(jnp.max(jnp.abs(logits_bf16 - ref))))

    print("KERNEL_OK")
</pallas_src>

<mosaic_0001>
module attributes {stable_mosaic.version = 11 : i64} {
  func.func @_head_kernel(%arg0: i32, %arg1: i32, %arg2: memref<2x32xf32, #tpu.memory_space<vmem>>, %arg3: memref<32x32xf32, #tpu.memory_space<vmem>>, %arg4: memref<3x32xf32, #tpu.memory_space<vmem>>, %arg5: memref<32x4xf32, #tpu.memory_space<vmem>>, %arg6: memref<1x4xf32, #tpu.memory_space<vmem>>, %arg7: memref<2x4xf32, #tpu.memory_space<vmem>>, %arg8: memref<2x32xf32, #tpu.memory_space<vmem>>) attributes {dimension_semantics = [#tpu.dimension_semantics<parallel>, #tpu.dimension_semantics<arbitrary>], iteration_bounds = array<i64: 1, 1>, scalar_prefetch = 0 : i64, scratch_operands = 1 : i64, tpu.core_type = #tpu.core_type<tc>, window_params = [{transform_indices = @transform_0, window_bounds = array<i64: 2, 32>}, {transform_indices = @transform_1, window_bounds = array<i64: 32, 32>}, {pipeline_mode = #tpu.pipeline_mode<synchronous>, transform_indices = @transform_2, window_bounds = array<i64: 3, 32>}, {pipeline_mode = #tpu.pipeline_mode<synchronous>, transform_indices = @transform_3, window_bounds = array<i64: 32, 4>}, {pipeline_mode = #tpu.pipeline_mode<synchronous>, transform_indices = @transform_4, window_bounds = array<i64: 1, 4>}, {transform_indices = @transform_5, window_bounds = array<i64: 2, 4>}]} {
    %c0_i32 = arith.constant 0 : i32
    %0 = arith.cmpi eq, %arg1, %c0_i32 : i32
    %1 = arith.extui %0 : i1 to i32
    %c0_i32_0 = arith.constant 0 : i32
    %2 = arith.cmpi ne, %1, %c0_i32_0 : i32
    scf.if %2 {
      %cst_10 = arith.constant 0.000000e+00 : f32
      %12 = vector.broadcast %cst_10 : f32 to vector<2x32xf32>
      %c0_11 = arith.constant 0 : index
      %c0_12 = arith.constant 0 : index
      %13 = vector.load %arg8[%c0_11, %c0_12] : memref<2x32xf32, #tpu.memory_space<vmem>>, vector<2x32xf32>
      tpu.vector_store %arg8[%c0_11, %c0_12], %12 {strides = array<i32>} : memref<2x32xf32, #tpu.memory_space<vmem>>, vector<2x32xf32>,
    } else {
    }
    %c0 = arith.constant 0 : index
    %c0_1 = arith.constant 0 : index
    %3 = vector.load %arg8[%c0, %c0_1] : memref<2x32xf32, #tpu.memory_space<vmem>>, vector<2x32xf32>
    %c0_2 = arith.constant 0 : index
    %c0_3 = arith.constant 0 : index
    %4 = vector.load %arg2[%c0_2, %c0_3] : memref<2x32xf32, #tpu.memory_space<vmem>>, vector<2x32xf32>
    %c0_4 = arith.constant 0 : index
    %c0_5 = arith.constant 0 : index
    %5 = vector.load %arg3[%c0_4, %c0_5] : memref<32x32xf32, #tpu.memory_space<vmem>>, vector<32x32xf32>
    %cst = arith.constant dense<0.000000e+00> : vector<2x32xf32>
    %6 = tpu.matmul %4, %5, %cst {dimension_numbers = #tpu.dot_dimension_numbers<[1], [0], [0], [1], [0, 0, 1, 1], [], []>} : vector<2x32xf32>, vector<32x32xf32>, vector<2x32xf32> -> vector<2x32xf32>
    %7 = arith.addf %3, %6 : vector<2x32xf32>
    %c0_6 = arith.constant 0 : index
    %c0_7 = arith.constant 0 : index
    %8 = vector.load %arg8[%c0_6, %c0_7] : memref<2x32xf32, #tpu.memory_space<vmem>>, vector<2x32xf32>
    tpu.vector_store %arg8[%c0_6, %c0_7], %7 {strides = array<i32>} : memref<2x32xf32, #tpu.memory_space<vmem>>, vector<2x32xf32>,
    %c0_i32_8 = arith.constant 0 : i32
    %9 = arith.cmpi eq, %arg1, %c0_i32_8 : i32
    %10 = arith.extui %9 : i1 to i32
    %c0_i32_9 = arith.constant 0 : i32
    %11 = arith.cmpi ne, %10, %c0_i32_9 : i32
    scf.if %11 {
      %c0_10 = arith.constant 0 : index
      %c0_11 = arith.constant 0 : index
      %12 = vector.load %arg4[%c0_10, %c0_11] : memref<3x32xf32, #tpu.memory_space<vmem>>, vector<3x32xf32>
      %c0_12 = arith.constant 0 : index
      %c0_13 = arith.constant 0 : index
      %13 = vector.load %arg8[%c0_12, %c0_13] : memref<2x32xf32, #tpu.memory_space<vmem>>, vector<2x32xf32>
      %14 = vector.extract_strided_slice %12 {offsets = [0, 0], sizes = [1, 32], strides = [1, 1]} : vector<3x32xf32> to vector<1x32xf32>
      %15 = vector.broadcast %14 : vector<1x32xf32> to vector<2x32xf32>
      %16 = arith.addf %13, %15 : vector<2x32xf32>
      %c0_14 = arith.constant 0 : index
      %c0_15 = arith.constant 0 : index
      %17 = vector.load %arg8[%c0_14, %c0_15] : memref<2x32xf32, #tpu.memory_space<vmem>>, vector<2x32xf32>
      tpu.vector_store %arg8[%c0_14, %c0_15], %16 {strides = array<i32>} : memref<2x32xf32, #tpu.memory_space<vmem>>, vector<2x32xf32>,
      %c0_16 = arith.constant 0 : index
      %c0_17 = arith.constant 0 : index
      %18 = vector.load %arg8[%c0_16, %c0_17] : memref<2x32xf32, #tpu.memory_space<vmem>>, vector<2x32xf32>
      %cst_18 = arith.constant dense<0.000000e+00> : vector<2xf32>
      %19 = vector.multi_reduction <add>, %18, %cst_18 [1] : vector<2x32xf32> to vector<2xf32>
      %20 = vector.shape_cast %19 : vector<2xf32> to vector<2x1xf32>
      %cst_19 = arith.constant 3.200000e+01 : f32
      %21 = vector.broadcast %cst_19 : f32 to vector<2x1xf32>
      %22 = arith.divf %20, %21 : vector<2x1xf32>
      %23 = vector.broadcast %22 : vector<2x1xf32> to vector<2x32xf32>
      %24 = arith.subf %18, %23 : vector<2x32xf32>
      %c0_20 = arith.constant 0 : index
      %c0_21 = arith.constant 0 : index
      %25 = vector.load %arg8[%c0_20, %c0_21] : memref<2x32xf32, #tpu.memory_space<vmem>>, vector<2x32xf32>
      tpu.vector_store %arg8[%c0_20, %c0_21], %24 {strides = array<i32>} : memref<2x32xf32, #tpu.memory_space<vmem>>, vector<2x32xf32>,
      %c0_22 = arith.constant 0 : index
      %c0_23 = arith.constant 0 : index
      %26 = vector.load %arg8[%c0_22, %c0_23] : memref<2x32xf32, #tpu.memory_space<vmem>>, vector<2x32xf32>
      %27 = arith.mulf %26, %26 : vector<2x32xf32>
      %cst_24 = arith.constant dense<0.000000e+00> : vector<2xf32>
      %28 = vector.multi_reduction <add>, %27, %cst_24 [1] : vector<2x32xf32> to vector<2xf32>
      %29 = vector.shape_cast %28 : vector<2xf32> to vector<2x1xf32>
      %cst_25 = arith.constant 3.200000e+01 : f32
      %30 = vector.broadcast %cst_25 : f32 to vector<2x1xf32>
      %31 = arith.divf %29, %30 : vector<2x1xf32>
      %cst_26 = arith.constant 9.99999974E-6 : f32
      %32 = vector.broadcast %cst_26 : f32 to vector<2x1xf32>
      %33 = arith.addf %31, %32 : vector<2x1xf32>
      %34 = math.rsqrt %33 : vector<2x1xf32>
      %35 = vector.broadcast %34 : vector<2x1xf32> to vector<2x32xf32>
      %36 = arith.mulf %26, %35 : vector<2x32xf32>
      %37 = vector.extract_strided_slice %12 {offsets = [1, 0], sizes = [1, 32], strides = [1, 1]} : vector<3x32xf32> to vector<1x32xf32>
      %38 = vector.broadcast %37 : vector<1x32xf32> to vector<2x32xf32>
      %39 = arith.mulf %36, %38 : vector<2x32xf32>
      %40 = vector.extract_strided_slice %12 {offsets = [2, 0], sizes = [1, 32], strides = [1, 1]} : vector<3x32xf32> to vector<1x32xf32>
      %41 = vector.broadcast %40 : vector<1x32xf32> to vector<2x32xf32>
      %42 = arith.addf %39, %41 : vector<2x32xf32>
      %c0_27 = arith.constant 0 : index
      %c0_28 = arith.constant 0 : index
      %43 = vector.load %arg8[%c0_27, %c0_28] : memref<2x32xf32, #tpu.memory_space<vmem>>, vector<2x32xf32>
      tpu.vector_store %arg8[%c0_27, %c0_28], %42 {strides = array<i32>} : memref<2x32xf32, #tpu.memory_space<vmem>>, vector<2x32xf32>,
      %c0_29 = arith.constant 0 : index
      %c0_30 = arith.constant 0 : index
      %44 = vector.load %arg8[%c0_29, %c0_30] : memref<2x32xf32, #tpu.memory_space<vmem>>, vector<2x32xf32>
      %cst_31 = arith.constant 5.000000e-01 : f32
      %45 = vector.broadcast %cst_31 : f32 to vector<2x32xf32>
      %46 = arith.mulf %45, %44 : vector<2x32xf32>
      %cst_32 = arith.constant 0.707106769 : f32
      %47 = vector.broadcast %cst_32 : f32 to vector<2x32xf32>
      %48 = arith.mulf %44, %47 : vector<2x32xf32>
      %49 = math.erf %48 : vector<2x32xf32>
      %cst_33 = arith.constant 1.000000e+00 : f32
      %50 = vector.broadcast %cst_33 : f32 to vector<2x32xf32>
      %51 = arith.addf %50, %49 : vector<2x32xf32>
      %52 = arith.mulf %46, %51 : vector<2x32xf32>
      %c0_34 = arith.constant 0 : index
      %c0_35 = arith.constant 0 : index
      %53 = vector.load %arg5[%c0_34, %c0_35] : memref<32x4xf32, #tpu.memory_space<vmem>>, vector<32x4xf32>
      %cst_36 = arith.constant dense<0.000000e+00> : vector<2x4xf32>
      %54 = tpu.matmul %52, %53, %cst_36 {dimension_numbers = #tpu.dot_dimension_numbers<[1], [0], [0], [1], [0, 0, 1, 1], [], []>} : vector<2x32xf32>, vector<32x4xf32>, vector<2x4xf32> -> vector<2x4xf32>
      %c0_37 = arith.constant 0 : index
      %c0_38 = arith.constant 0 : index
      %55 = vector.load %arg6[%c0_37, %c0_38] : memref<1x4xf32, #tpu.memory_space<vmem>>, vector<1x4xf32>
      %56 = vector.broadcast %55 : vector<1x4xf32> to vector<2x4xf32>
      %57 = arith.addf %54, %56 : vector<2x4xf32>
      %c0_39 = arith.constant 0 : index
      %c0_40 = arith.constant 0 : index
      %58 = vector.load %arg7[%c0_39, %c0_40] : memref<2x4xf32, #tpu.memory_space<vmem>>, vector<2x4xf32>
      tpu.vector_store %arg7[%c0_39, %c0_40], %57 {strides = array<i32>} : memref<2x4xf32, #tpu.memory_space<vmem>>, vector<2x4xf32>,
    } else {
    }
    return
  }
  func.func @transform_0(%arg0: i32, %arg1: i32) -> (i32, i32) {
    %c0_i32 = arith.constant 0 : i32
    return %arg0, %arg1 : i32, i32
  }
  func.func @transform_1(%arg0: i32, %arg1: i32) -> (i32, i32) {
    %c0_i32 = arith.constant 0 : i32
    %c0_i32_0 = arith.constant 0 : i32
    return %arg1, %c0_i32 : i32, i32
  }
  func.func @transform_2(%arg0: i32, %arg1: i32) -> (i32, i32) {
    %c0_i32 = arith.constant 0 : i32
    %c0_i32_0 = arith.constant 0 : i32
    %c0_i32_1 = arith.constant 0 : i32
    return %c0_i32, %c0_i32_0 : i32, i32
  }
  func.func @transform_3(%arg0: i32, %arg1: i32) -> (i32, i32) {
    %c0_i32 = arith.constant 0 : i32
    %c0_i32_0 = arith.constant 0 : i32
    %c0_i32_1 = arith.constant 0 : i32
    return %c0_i32, %c0_i32_0 : i32, i32
  }
  func.func @transform_4(%arg0: i32, %arg1: i32) -> (i32, i32) {
    %c0_i32 = arith.constant 0 : i32
    %c0_i32_0 = arith.constant 0 : i32
    %c0_i32_1 = arith.constant 0 : i32
    return %c0_i32, %c0_i32_0 : i32, i32
  }
  func.func @transform_5(%arg0: i32, %arg1: i32) -> (i32, i32) {
    %c0_i32 = arith.constant 0 : i32
    %c0_i32_0 = arith.constant 0 : i32
    return %arg0, %c0_i32 : i32, i32
  }
}

</mosaic_0001>

<bundles_post_ra>
// kernel: tpu_custom_call.1
= control target key start
LH: loop header
LB: loop body
LE: loop exit
PB: predicated region body
PF: predicated region fallthrough
CT: control target
= control target key end

     0   :  { %10 = vsyncpa [#allocation4], 0  ;;  %s359_s0 = inlined_call_operand.hbm [shape: f32[2,32], index: 0, kind: input, shape index: {}]   ;;  %s360_s1 = inlined_call_operand.vmem [shape: f32[32,32], index: 1, kind: input, shape index: {}]   ;;  %s361_s2 = inlined_call_operand.vmem [shape: f32[3,32], index: 2, kind: input, shape index: {}]   ;;  %s362_s3 = inlined_call_operand.vmem [shape: f32[32,4], index: 3, kind: input, shape index: {}]   ;;  %s363_s4 = inlined_call_operand.vmem [shape: f32[1,4], index: 4, kind: input, shape index: {}]   ;;  %s364_s5 = inlined_call_operand.hbm [shape: f32[2,4], index: 5, kind: output, shape index: {}]  }
   0x1   :  { %11 = vsyncpa [#allocation5], 0  ;;  %s17_s20 = sshll.u32 %s359_s0, 4  ;;  %s280_s21 = smov [#allocation3]   ;;  %s18_s20 = int_to_ptr.hbm [resolvable:$true] %s17_s20 }
   0x2   :  { %s19_s22 = sshll.u32 %s280_s21, 4  ;;  %s20_s22 = int_to_ptr.vmem [resolvable:$true] %s19_s22 }
   0x3   :  { %22 = dma.hbm_to_vmem [thread:$0]  %s18_s20, 32, %s20_s22, [#allocation4]  }
   0x4   :  { %276 = dma.done.wait [#allocation4], 32  }
   0x5   :  { %277 = vsyncadd [#allocation4], 4294967264  ;;  %vm39_vm0 = vcmask 254976   ;;  %v281_v0 = vmov 0.0   ;;  %v46_v1 = vld [vmem:[%s360_s1 + $0x18] sm:$0xff]  ;;  %v45_v2 = vld [vmem:[%s360_s1 + $0x10] sm:$0xff] }
   0x6   :  { %40 = vst.msk [vmem:[#allocation2] sm:$0x3] %vm39_vm0, %v281_v0  ;;  %63 = vmatpush.msra.mxu0 %v46_v1  ;;  %v44_v3 = vld [vmem:[%s360_s1 + $0x8] sm:$0xff]  ;;  %v43_v4 = vld [vmem:[%s360_s1] sm:$0xff]  ;;  %vm47_vm1 = vcmask 261120   ;;  %v282_v15 = vmov 32.0  }
   0x7   :  { %v42_v5 = vld [vmem:[#allocation3] sm:$0x3]  ;;  %222 = vrcp.f32 %v282_v15  ;;  %v167_v28 = vld [vmem:[%s362_s3 + $0x18] sm:$0xff]  ;;  %v166_v29 = vld [vmem:[%s362_s3 + $0x10] sm:$0xff]  ;;  %s283_s14 = smov [#allocation6]   ;;  %s204_s18 = sshll.u32 %s364_s5, 4  ;;  %s205_s18 = int_to_ptr.hbm [resolvable:$true] %s204_s18 }
   0x8   :  { %64 = vmatpush.msra.mxu0 %v45_v2  ;;  %v77_v9 = vld [vmem:[%s361_s2] sm:$0x7]  ;;  %187 = vmatpush.msra.mxu1 %v167_v28  ;;  %v165_v30 = vld [vmem:[%s362_s3 + $0x8] sm:$0xff]  ;;  %s202_s15 = sshll.u32 %s283_s14, 4  ;;  %vm195_vm10 = vcmask 25600   ;;  %s203_s15 = int_to_ptr.vmem [resolvable:$true] %s202_s15 }
   0x9   :  { %v79_v10 = vperm.slane %v77_v9, 0  ;;  %v164_v33 = vld [vmem:[%s362_s3] sm:$0xff]  ;;  %v114_v41 = vperm.slane %v77_v9, 1  ;;  %v116_v43 = vperm.slane %v77_v9, 2 }
   0xa   :  { %65 = vmatpush.msra.mxu0 %v44_v3  ;;  %188 = vmatpush.msra.mxu1 %v166_v29 }
   0xc   :  { %66 = vmatpush.msra.mxu0 %v43_v4  ;;  %189 = vmatpush.msra.mxu1 %v165_v30 }
   0xd   :  { %214 = vmatmul.msk.f32.vlgmr.msra.gmra.mxu0 %vm47_vm1, %v42_v5  ;;  %v41_v6 = vld [vmem:[#allocation2] sm:$0x3]  ;;  %v223_v16 = vpop.eup %222 }
   0xe   :  { %v87_v17 = vmul.f32 32.0, %v223_v16  ;;  %vm91_vm2 = vweird.f32 %v223_v16  ;;  %190 = vmatpush.msra.mxu1 %v164_v33 }
  0x10   :  { %v88_v18 = vsub.f32 1.0, %v87_v17 }
  0x12   :  { %v89_v19 = vmul.f32 %v223_v16, %v88_v18 }
  0x14   :  { %v90_v20 = vadd.f32 %v223_v16, %v89_v19 }
  0x16   :  { %v92_v21 = vsel %vm91_vm2, %v223_v16, %v90_v20 }
  0x8a   :  { %v68_v7 = vpop.f32.mrf.mxu0 }
  0x8b   :  { %v71_v8 = vadd.f32 %v68_v7, %v41_v6 }
  0x8d   :  { %73 = vst.msk [vmem:[#allocation2] sm:$0x3] %vm39_vm0, %v71_v8 }
  0x94   :  { %v78_v11 = vld [vmem:[#allocation2] sm:$0x3] }
  0x95   :  { %v80_v12 = vadd.f32 %v79_v10, %v78_v11 }
  0x97   :  { %81 = vst.msk [vmem:[#allocation2] sm:$0x3] %vm39_vm0, %v80_v12 }
  0x9e   :  { %v82_v13 = vld [vmem:[#allocation2] sm:$0x3] }
  0x9f   :  { %v83_v14 = vsel %vm39_vm0, %v82_v13, 0.0 }
  0xa0   :  { %84 = vadd.xlane.f32.xlu0 %v83_v14 }
 0x113   :  { %v85_v22 = vpop.xlane.xlu0 %84 }
 0x114   :  { %v93_v23 = vmul.f32 %v92_v21, %v85_v22 }
 0x116   :  { %v94_v24 = vsub.f32 %v82_v13, %v93_v23  ;;  %v221_v23 = vld [vmem:[%s363_s4] ss:$0 sm:$0xff] }
 0x118   :  { %95 = vst.msk [vmem:[#allocation2] sm:$0x3] %vm39_vm0, %v94_v24 }
 0x11f   :  { %v96_v25 = vld [vmem:[#allocation2] sm:$0x3] }
 0x120   :  { %v97_v26 = vmul.f32 %v96_v25, %v96_v25 }
 0x122   :  { %v98_v27 = vsel %vm39_vm0, %v97_v26, 0.0 }
 0x123   :  { %99 = vadd.xlane.f32.xlu0 %v98_v27 }
 0x196   :  { %v100_v31 = vpop.xlane.xlu0 %99 }
 0x197   :  { %v101_v32 = vmul.f32 %v100_v31, %v92_v21 }
 0x199   :  { %v102_v34 = vadd.f32 1e-05, %v101_v32 }
 0x19b   :  { %224 = vrsqrt.f32 %v102_v34  ;;  %vm109_vm4 = vweird.f32 %v102_v34 }
 0x1a1   :  { %v225_v35 = vpop.eup %224 }
 0x1a2   :  { %v104_v36 = vmul.f32 %v225_v35, %v102_v34  ;;  %vm110_vm3 = vweird.f32 %v225_v35 }
 0x1a3   :  { %vm111_vm5 = vmor %vm109_vm4, %vm110_vm3 }
 0x1a4   :  { %v105_v37 = vmul.f32 %v225_v35, %v104_v36 }
 0x1a6   :  { %v106_v38 = vmul.f32 0.5, %v105_v37 }
 0x1a8   :  { %v107_v39 = vsub.f32 1.5, %v106_v38 }
 0x1aa   :  { %v108_v40 = vmul.f32 %v225_v35, %v107_v39 }
 0x1ac   :  { %v112_v42 = vsel %vm111_vm5, %v225_v35, %v108_v40 }
 0x1ad   :  { %v113_v44 = vmul.f32 %v112_v42, %v96_v25 }
 0x1af   :  { %v115_v45 = vmul.f32 %v114_v41, %v113_v44 }
 0x1b1   :  { %v117_v46 = vadd.f32 %v116_v43, %v115_v45 }
 0x1b3   :  { %118 = vst.msk [vmem:[#allocation2] sm:$0x3] %vm39_vm0, %v117_v46 }
 0x1ba   :  { %v119_v47 = vld [vmem:[#allocation2] sm:$0x3] }
 0x1bb   :  { %v121_v48 = vmul.f32 0.70710677, %v119_v47  ;;  %v120_v20 = vmul.f32 0.5, %v119_v47 }
 0x1bd   :  { %v122_v49 = vmul.f32 %v121_v48, %v121_v48 }
 0x1bf   :  { %v123_v50 = vmin.f32 %v122_v49, 16.0 }
 0x1c1   :  { %v124_v51 = vmul.f32 2.1237322e-06, %v123_v50  ;;  %v135_v52 = vmul.f32 3.8918573e-05, %v123_v50 }
 0x1c3   :  { %v125_v53 = vadd.f32 0.00028619796, %v124_v51  ;;  %v136_v54 = vadd.f32 0.001143296, %v135_v52 }
 0x1c5   :  { %v126_v55 = vmul.f32 %v125_v53, %v123_v50  ;;  %v137_v56 = vmul.f32 %v136_v54, %v123_v50 }
 0x1c7   :  { %v138_v57 = vadd.f32 0.014752088, %v137_v56  ;;  %v127_v58 = vadd.f32 0.0036580483, %v126_v55 }
 0x1c9   :  { %v139_v59 = vmul.f32 %v138_v57, %v123_v50  ;;  %v128_v61 = vmul.f32 %v127_v58, %v123_v50 }
 0x1cb   :  { %v140_v60 = vadd.f32 0.112945676, %v139_v59  ;;  %v129_v0 = vadd.f32 0.05243302, %v128_v61 }
 0x1cd   :  { %v141_v62 = vmul.f32 %v140_v60, %v123_v50  ;;  %v130_v3 = vmul.f32 %v129_v0, %v123_v50 }
 0x1cf   :  { %v142_v63 = vadd.f32 0.4994258, %v141_v62  ;;  %v131_v4 = vadd.f32 0.18741608, %v130_v3 }
 0x1d1   :  { %v143_v1 = vmul.f32 %v142_v63, %v123_v50  ;;  %v132_v6 = vmul.f32 %v131_v4, %v123_v50 }
 0x1d3   :  { %v144_v2 = vadd.f32 1.0, %v143_v1  ;;  %v133_v10 = vadd.f32 1.1283791, %v132_v6 }
 0x1d5   :  { %226 = vrcp.f32 %v144_v2  ;;  %v156_v9 = vand.u32 2147483648, %v144_v2  ;;  %v154_v12 = vand.u32 2147483647, %v144_v2  ;;  %vm150_vm7 = vweird.f32 %v144_v2 }
 0x1d6   :  { %v134_v15 = vmul.f32 %v133_v10, %v121_v48 }
 0x1d7   :  { %v157_v14 = vor.u32 1.1754944e-38, %v156_v9  ;;  %vm155_vm9 = vcmp.eq.f32.partialorder %v154_v12, 8.507059e+37 }
 0x1db   :  { %v227_v5 = vpop.eup %226 }
 0x1dc   :  { %v146_v7 = vmul.f32 %v227_v5, %v144_v2  ;;  %vm151_vm6 = vweird.f32 %v227_v5 }
 0x1dd   :  { %vm152_vm8 = vmor %vm150_vm7, %vm151_vm6 }
 0x1de   :  { %v147_v8 = vsub.f32 1.0, %v146_v7 }
 0x1e0   :  { %v148_v11 = vmul.f32 %v227_v5, %v147_v8 }
 0x1e2   :  { %v149_v13 = vadd.f32 %v227_v5, %v148_v11 }
 0x1e4   :  { %v153_v16 = vsel %vm152_vm8, %v227_v5, %v149_v13 }
 0x1e5   :  { %v158_v17 = vsel %vm155_vm9, %v157_v14, %v153_v16 }
 0x1e6   :  { %v159_v18 = vmul.f32 %v158_v17, %v134_v15 }
 0x1e8   :  { %v215_v19 = vclamps-f32 %v159_v18, 1.0 }
 0x1ea   :  { %v162_v21 = vadd.f32 1.0, %v215_v19 }
 0x1ec   :  { %v163_v22 = vmul.f32 %v162_v21, %v120_v20 }
 0x1ee   :  { %216 = vmatmul.msk.f32.vlgmr.msra.gmra.mxu1 %vm47_vm1, %v163_v22 }
 0x26b   :  { %v192_v24 = vpop.f32.mrf.mxu1 }
 0x26c   :  { %v193_v25 = vadd.f32 %v221_v23, %v192_v24 }
 0x26e   :  { %196 = vst.msk [vmem:[#allocation6] sm:$0x3] %vm195_vm10, %v193_v25 }
 0x26f   :  { %207 = dma.vmem_to_hbm [thread:$0]  %s203_s15, 32, %s205_s18, [#allocation5]  }
 0x270   :  { %278 = dma.done.wait [#allocation5], 32  }
 0x271   :  { %279 = vsyncadd [#allocation5], 4294967264 }
 0x272   :  { %212 = vsyncpa [#allocation4], 1 }
 0x273   :  { %213 = vsyncpa [#allocation5], 1 }

</bundles_post_ra>
